<compile_context>
chip_gen: v6e
topology: v6e:2x2x1
jax: 0.10.0
libtpu: 0.0.40
codegen_flags: <defaults>
</compile_context>

<pallas_src>
import jax
import jax.numpy as jnp
from jax import lax
from jax.experimental import pallas as pl
from jax.experimental.pallas import tpu as pltpu  # noqa: F401  (TPU backend)
from jax.scipy.linalg import solve_triangular

N_SAMPLES = 256
HIDDEN = 32
POLY_ORDER = 2                     # library poly terms: 1, u, u^2
DIFF_ORDER = 2                     # library deriv terms: 1, u_x, u_xx
N_TERMS = (POLY_ORDER + 1) * (DIFF_ORDER + 1)   # 9


def deepmod_kernel(xT_ref, w1t0_ref, w1t1_ref, b1t_ref,
                   w2t_ref, b2t_ref, w3t_ref, b3_ref,
                   slab_ref, gram_ref):
    n = xT_ref.shape[1]                      # number of samples (lane axis)

    t = xT_ref[0:1, :]                       # (1, N) time coordinate
    xc = xT_ref[1:2, :]                      # (1, N) spatial coordinate

    w1t0 = w1t0_ref[...]                     # (H, 1) weights of the t input
    w1t1 = w1t1_ref[...]                     # (H, 1) weights of the x input

    # ---- layer 1: analytic tangents (a_t = w1t0, a_x = w1t1, a_xx = 0) ----
    a1 = w1t0 * t + w1t1 * xc + b1t_ref[...]                 # (H, N) VPU FMAs
    h1 = jnp.tanh(a1)
    d1 = 1.0 - h1 * h1                                       # tanh'
    d2 = -2.0 * h1 * d1                                      # tanh''
    z1 = h1
    z1_t = d1 * w1t0
    z1_x = d1 * w1t1
    z1_xx = d2 * (w1t1 * w1t1)

    # ---- layer 2: one matmul over the 4 stacked tangent streams ----
    stack1 = jnp.concatenate([z1, z1_t, z1_x, z1_xx], axis=1)        # (H, 4N)
    m2 = jnp.dot(w2t_ref[...], stack1, preferred_element_type=jnp.float32)
    a2 = m2[:, 0:n] + b2t_ref[...]
    a2_t = m2[:, n:2 * n]
    a2_x = m2[:, 2 * n:3 * n]
    a2_xx = m2[:, 3 * n:4 * n]
    h2 = jnp.tanh(a2)
    d1 = 1.0 - h2 * h2
    d2 = -2.0 * h2 * d1
    z2 = h2
    z2_t = d1 * a2_t
    z2_x = d1 * a2_x
    z2_xx = d2 * a2_x * a2_x + d1 * a2_xx

    # ---- head (linear): one matmul over the 4 stacked streams ----
    stack2 = jnp.concatenate([z2, z2_t, z2_x, z2_xx], axis=1)        # (H, 4N)
    m3 = jnp.dot(w3t_ref[...], stack2, preferred_element_type=jnp.float32)
    u = m3[:, 0:n] + b3_ref[...]                                     # (1, N)
    u_t = m3[:, n:2 * n]
    u_x = m3[:, 2 * n:3 * n]
    u_xx = m3[:, 3 * n:4 * n]

    # ---- Library1D: theta^T = kron([1, u, u^2], [1, u_x, u_xx]) ----
    ones = jnp.ones_like(u)
    deriv = jnp.concatenate([ones, u_x, u_xx], axis=0)               # (3, N)
    theta_T = jnp.concatenate([deriv, u * deriv, (u * u) * deriv],
                              axis=0)                                # (9, N)

    # ---- fused outputs ----
    A = jnp.concatenate([u_t, theta_T], axis=0)                      # (10, N)
    slab_ref[...] = jnp.concatenate([u, A], axis=0)                  # (11, N)

    # gram_aug = [u_t; theta] [u_t; theta]^T, contract over lanes (K = N)
    gram_ref[...] = lax.dot_general(A, A, (((1,), (1,)), ((), ())),
                                    preferred_element_type=jnp.float32)


def deepmod_forward(x, params):
    """DeepMoD.forward: (prediction, [time_deriv], [theta], coeffs, norms, mask)."""
    w1, b1, w2, b2, w3, b3 = params
    n = x.shape[0]
    f32 = jnp.float32

    # Feature-major / transposed operands (layout plumbing in plain JAX).
    xT = x.T.astype(f32)                    # (2, N)
    w1t0 = w1[0:1, :].T.astype(f32)         # (H, 1)
    w1t1 = w1[1:2, :].T.astype(f32)         # (H, 1)
    b1t = b1.T.astype(f32)                  # (H, 1)
    w2t = w2.T.astype(f32)                  # (H, H)
    b2t = b2.T.astype(f32)                  # (H, 1)
    w3t = w3.T.astype(f32)                  # (1, H)
    b3 = b3.astype(f32)                     # (1, 1)

    out_shape = (
        jax.ShapeDtypeStruct((1 + 1 + N_TERMS, n), f32),           # [u; u_t; theta^T]
        jax.ShapeDtypeStruct((1 + N_TERMS, 1 + N_TERMS), f32),     # gram_aug
    )
    # No grid / no BlockSpecs: single invocation, full arrays resident in VMEM.
    slab, gram_aug = pl.pallas_call(deepmod_kernel, out_shape=out_shape)(
        xT, w1t0, w1t1, b1t, w2t, b2t, w3t, b3)

    slab_T = slab.T                          # (N, 11)
    prediction = slab_T[:, 0:1]              # (N, 1)
    time_deriv = slab_T[:, 1:2]              # (N, 1)
    theta = slab_T[:, 2:]                    # (N, 9)

    # Constraint (LeastSquares): QR solve, as in the reference implementation
    # (avoids squaring the condition number of a near-collinear library).
    q, r = jnp.linalg.qr(theta)
    coeffs = solve_triangular(r, q.T @ time_deriv, lower=False)      # (9, 1)

    # library.norms: ||u_t||_F / ||theta_col||, derived from fused gram_aug.
    utsq = gram_aug[0, 0]
    colsq = jnp.diagonal(gram_aug)[1:]
    norms = jnp.sqrt(utsq) / jnp.sqrt(colsq)

    # constraint.sparsity_masks[0]: all-True on the first forward pass.
    sparsity_mask = jnp.ones((N_TERMS,), dtype=jnp.bool_)
    # TODO(synk): sparse_estimator.fit (host-side sklearn sparse regression)
    # is not invoked in DeepMoD.forward and has no Pallas equivalent; omitted.
    return prediction, [time_deriv], [theta], coeffs, norms, sparsity_mask


def _linear_init(key, fan_in, fan_out):
    kw, kb = jax.random.split(key)
    bound = 1.0 / jnp.sqrt(jnp.float32(fan_in))
    W = jax.random.uniform(kw, (fan_in, fan_out), jnp.float32, -bound, bound)
    b = jax.random.uniform(kb, (1, fan_out), jnp.float32, -bound, bound)
    return W, b


if __name__ == "__main__":
    key = jax.random.PRNGKey(0)
    kx, k1, k2, k3 = jax.random.split(key, 4)
    x = jax.random.uniform(kx, (N_SAMPLES, 2), jnp.float32, -1.0, 1.0)
    w1, b1 = _linear_init(k1, 2, HIDDEN)
    w2, b2 = _linear_init(k2, HIDDEN, HIDDEN)
    w3, b3 = _linear_init(k3, HIDDEN, 1)

    pred, time_derivs, thetas, coeffs, norms, mask = deepmod_forward(
        x, (w1, b1, w2, b2, w3, b3))
    jax.block_until_ready((pred, time_derivs[0], thetas[0], coeffs, norms))

    assert pred.shape == (N_SAMPLES, 1)
    assert time_derivs[0].shape == (N_SAMPLES, 1)
    assert thetas[0].shape == (N_SAMPLES, N_TERMS)
    assert coeffs.shape == (N_TERMS, 1)
    assert norms.shape == (N_TERMS,)
    assert mask.shape == (N_TERMS,)

    ok = bool(jnp.isfinite(pred).all()
              & jnp.isfinite(time_derivs[0]).all()
              & jnp.isfinite(thetas[0]).all()
              & jnp.isfinite(coeffs).all()
              & jnp.isfinite(norms).all())
    if ok:
        print("KERNEL_OK")
</pallas_src>

<mosaic_0001>
module attributes {stable_mosaic.version = 11 : i64} {
  func.func @deepmod_kernel(%arg0: memref<2x256xf32, #tpu.memory_space<vmem>>, %arg1: memref<32x1xf32, #tpu.memory_space<vmem>>, %arg2: memref<32x1xf32, #tpu.memory_space<vmem>>, %arg3: memref<32x1xf32, #tpu.memory_space<vmem>>, %arg4: memref<32x32xf32, #tpu.memory_space<vmem>>, %arg5: memref<32x1xf32, #tpu.memory_space<vmem>>, %arg6: memref<1x32xf32, #tpu.memory_space<vmem>>, %arg7: memref<1x1xf32, #tpu.memory_space<vmem>>, %arg8: memref<11x256xf32, #tpu.memory_space<vmem>>, %arg9: memref<10x10xf32, #tpu.memory_space<vmem>>) attributes {dimension_semantics = [], scalar_prefetch = 0 : i64, scratch_operands = 0 : i64, tpu.core_type = #tpu.core_type<tc>} {
    %c0 = arith.constant 0 : index
    %c0_0 = arith.constant 0 : index
    %0 = vector.load %arg0[%c0, %c0_0] : memref<2x256xf32, #tpu.memory_space<vmem>>, vector<1x256xf32>
    %c1 = arith.constant 1 : index
    %c0_1 = arith.constant 0 : index
    %1 = vector.load %arg0[%c1, %c0_1] : memref<2x256xf32, #tpu.memory_space<vmem>>, vector<1x256xf32>
    %c0_2 = arith.constant 0 : index
    %c0_3 = arith.constant 0 : index
    %2 = vector.load %arg1[%c0_2, %c0_3] : memref<32x1xf32, #tpu.memory_space<vmem>>, vector<32x1xf32>
    %c0_4 = arith.constant 0 : index
    %c0_5 = arith.constant 0 : index
    %3 = vector.load %arg2[%c0_4, %c0_5] : memref<32x1xf32, #tpu.memory_space<vmem>>, vector<32x1xf32>
    %4 = vector.broadcast %2 : vector<32x1xf32> to vector<32x256xf32>
    %5 = vector.broadcast %0 : vector<1x256xf32> to vector<32x256xf32>
    %6 = arith.mulf %4, %5 : vector<32x256xf32>
    %7 = vector.broadcast %3 : vector<32x1xf32> to vector<32x256xf32>
    %8 = vector.broadcast %1 : vector<1x256xf32> to vector<32x256xf32>
    %9 = arith.mulf %7, %8 : vector<32x256xf32>
    %10 = arith.addf %6, %9 : vector<32x256xf32>
    %c0_6 = arith.constant 0 : index
    %c0_7 = arith.constant 0 : index
    %11 = vector.load %arg3[%c0_6, %c0_7] : memref<32x1xf32, #tpu.memory_space<vmem>>, vector<32x1xf32>
    %12 = vector.broadcast %11 : vector<32x1xf32> to vector<32x256xf32>
    %13 = arith.addf %10, %12 : vector<32x256xf32>
    %14 = math.tanh %13 : vector<32x256xf32>
    %15 = arith.mulf %14, %14 : vector<32x256xf32>
    %cst = arith.constant 1.000000e+00 : f32
    %16 = vector.broadcast %cst : f32 to vector<32x256xf32>
    %17 = arith.subf %16, %15 : vector<32x256xf32>
    %cst_8 = arith.constant -2.000000e+00 : f32
    %18 = vector.broadcast %cst_8 : f32 to vector<32x256xf32>
    %19 = arith.mulf %18, %14 : vector<32x256xf32>
    %20 = arith.mulf %19, %17 : vector<32x256xf32>
    %21 = vector.broadcast %2 : vector<32x1xf32> to vector<32x256xf32>
    %22 = arith.mulf %17, %21 : vector<32x256xf32>
    %23 = vector.broadcast %3 : vector<32x1xf32> to vector<32x256xf32>
    %24 = arith.mulf %17, %23 : vector<32x256xf32>
    %25 = arith.mulf %3, %3 : vector<32x1xf32>
    %26 = vector.broadcast %25 : vector<32x1xf32> to vector<32x256xf32>
    %27 = arith.mulf %20, %26 : vector<32x256xf32>
    %28 = tpu.concatenate %14, %22, %24, %27 in 1 : vector<32x256xf32>, vector<32x256xf32>, vector<32x256xf32>, vector<32x256xf32> -> vector<32x1024xf32>
    %c0_9 = arith.constant 0 : index
    %c0_10 = arith.constant 0 : index
    %29 = vector.load %arg4[%c0_9, %c0_10] : memref<32x32xf32, #tpu.memory_space<vmem>>, vector<32x32xf32>
    %cst_11 = arith.constant dense<0.000000e+00> : vector<32x1024xf32>
    %30 = tpu.matmul %29, %28, %cst_11 {dimension_numbers = #tpu.dot_dimension_numbers<[1], [0], [0], [1], [0, 0, 1, 1], [], []>} : vector<32x32xf32>, vector<32x1024xf32>, vector<32x1024xf32> -> vector<32x1024xf32>
    %31 = vector.extract_strided_slice %30 {offsets = [0, 0], sizes = [32, 256], strides = [1, 1]} : vector<32x1024xf32> to vector<32x256xf32>
    %c0_12 = arith.constant 0 : index
    %c0_13 = arith.constant 0 : index
    %32 = vector.load %arg5[%c0_12, %c0_13] : memref<32x1xf32, #tpu.memory_space<vmem>>, vector<32x1xf32>
    %33 = vector.broadcast %32 : vector<32x1xf32> to vector<32x256xf32>
    %34 = arith.addf %31, %33 : vector<32x256xf32>
    %35 = vector.extract_strided_slice %30 {offsets = [0, 256], sizes = [32, 256], strides = [1, 1]} : vector<32x1024xf32> to vector<32x256xf32>
    %36 = vector.extract_strided_slice %30 {offsets = [0, 512], sizes = [32, 256], strides = [1, 1]} : vector<32x1024xf32> to vector<32x256xf32>
    %37 = vector.extract_strided_slice %30 {offsets = [0, 768], sizes = [32, 256], strides = [1, 1]} : vector<32x1024xf32> to vector<32x256xf32>
    %38 = math.tanh %34 : vector<32x256xf32>
    %39 = arith.mulf %38, %38 : vector<32x256xf32>
    %cst_14 = arith.constant 1.000000e+00 : f32
    %40 = vector.broadcast %cst_14 : f32 to vector<32x256xf32>
    %41 = arith.subf %40, %39 : vector<32x256xf32>
    %cst_15 = arith.constant -2.000000e+00 : f32
    %42 = vector.broadcast %cst_15 : f32 to vector<32x256xf32>
    %43 = arith.mulf %42, %38 : vector<32x256xf32>
    %44 = arith.mulf %43, %41 : vector<32x256xf32>
    %45 = arith.mulf %41, %35 : vector<32x256xf32>
    %46 = arith.mulf %41, %36 : vector<32x256xf32>
    %47 = arith.mulf %44, %36 : vector<32x256xf32>
    %48 = arith.mulf %47, %36 : vector<32x256xf32>
    %49 = arith.mulf %41, %37 : vector<32x256xf32>
    %50 = arith.addf %48, %49 : vector<32x256xf32>
    %51 = tpu.concatenate %38, %45, %46, %50 in 1 : vector<32x256xf32>, vector<32x256xf32>, vector<32x256xf32>, vector<32x256xf32> -> vector<32x1024xf32>
    %c0_16 = arith.constant 0 : index
    %c0_17 = arith.constant 0 : index
    %52 = vector.load %arg6[%c0_16, %c0_17] : memref<1x32xf32, #tpu.memory_space<vmem>>, vector<1x32xf32>
    %cst_18 = arith.constant dense<0.000000e+00> : vector<1x1024xf32>
    %53 = tpu.matmul %52, %51, %cst_18 {dimension_numbers = #tpu.dot_dimension_numbers<[1], [0], [0], [1], [0, 0, 1, 1], [], []>} : vector<1x32xf32>, vector<32x1024xf32>, vector<1x1024xf32> -> vector<1x1024xf32>
    %54 = vector.extract_strided_slice %53 {offsets = [0, 0], sizes = [1, 256], strides = [1, 1]} : vector<1x1024xf32> to vector<1x256xf32>
    %c0_19 = arith.constant 0 : index
    %c0_20 = arith.constant 0 : index
    %55 = vector.load %arg7[%c0_19, %c0_20] : memref<1x1xf32, #tpu.memory_space<vmem>>, vector<1x1xf32>
    %56 = vector.broadcast %55 : vector<1x1xf32> to vector<1x256xf32>
    %57 = arith.addf %54, %56 : vector<1x256xf32>
    %58 = vector.extract_strided_slice %53 {offsets = [0, 256], sizes = [1, 256], strides = [1, 1]} : vector<1x1024xf32> to vector<1x256xf32>
    %59 = vector.extract_strided_slice %53 {offsets = [0, 512], sizes = [1, 256], strides = [1, 1]} : vector<1x1024xf32> to vector<1x256xf32>
    %60 = vector.extract_strided_slice %53 {offsets = [0, 768], sizes = [1, 256], strides = [1, 1]} : vector<1x1024xf32> to vector<1x256xf32>
    %cst_21 = arith.constant 1.000000e+00 : f32
    %61 = vector.broadcast %cst_21 : f32 to vector<1x256xf32>
    %62 = tpu.concatenate %61, %59, %60 in 0 : vector<1x256xf32>, vector<1x256xf32>, vector<1x256xf32> -> vector<3x256xf32>
    %63 = vector.broadcast %57 : vector<1x256xf32> to vector<3x256xf32>
    %64 = arith.mulf %63, %62 : vector<3x256xf32>
    %65 = arith.mulf %57, %57 : vector<1x256xf32>
    %66 = vector.broadcast %65 : vector<1x256xf32> to vector<3x256xf32>
    %67 = arith.mulf %66, %62 : vector<3x256xf32>
    %68 = tpu.concatenate %62, %64, %67 in 0 : vector<3x256xf32>, vector<3x256xf32>, vector<3x256xf32> -> vector<9x256xf32>
    %69 = tpu.concatenate %58, %68 in 0 : vector<1x256xf32>, vector<9x256xf32> -> vector<10x256xf32>
    %70 = tpu.concatenate %57, %69 in 0 : vector<1x256xf32>, vector<10x256xf32> -> vector<11x256xf32>
    %c0_22 = arith.constant 0 : index
    %c0_23 = arith.constant 0 : index
    %71 = vector.load %arg8[%c0_22, %c0_23] : memref<11x256xf32, #tpu.memory_space<vmem>>, vector<11x256xf32>
    tpu.vector_store %arg8[%c0_22, %c0_23], %70 {strides = array<i32>} : memref<11x256xf32, #tpu.memory_space<vmem>>, vector<11x256xf32>,
    %cst_24 = arith.constant dense<0.000000e+00> : vector<10x10xf32>
    %72 = tpu.matmul %69, %69, %cst_24 {dimension_numbers = #tpu.dot_dimension_numbers<[1], [1], [0], [0], [0, 0, 1, 0], [], []>} : vector<10x256xf32>, vector<10x256xf32>, vector<10x10xf32> -> vector<10x10xf32>
    %c0_25 = arith.constant 0 : index
    %c0_26 = arith.constant 0 : index
    %73 = vector.load %arg9[%c0_25, %c0_26] : memref<10x10xf32, #tpu.memory_space<vmem>>, vector<10x10xf32>
    tpu.vector_store %arg9[%c0_25, %c0_26], %72 {strides = array<i32>} : memref<10x10xf32, #tpu.memory_space<vmem>>, vector<10x10xf32>,
    return
  }
}

</mosaic_0001>

<bundles_post_ra>
// kernel: tpu_custom_call.1
= control target key start
LH: loop header
LB: loop body
LE: loop exit
PB: predicated region body
PF: predicated region fallthrough
CT: control target
= control target key end

     0   :  { %s1795_s0 = inlined_call_operand.vmem [shape: f32[2,256], index: 0, kind: input, shape index: {}]   ;;  %s1796_s1 = inlined_call_operand.vmem [shape: f32[32,1], index: 1, kind: input, shape index: {}]   ;;  %s1797_s2 = inlined_call_operand.vmem [shape: f32[32,1], index: 2, kind: input, shape index: {}]   ;;  %s1798_s3 = inlined_call_operand.vmem [shape: f32[32,1], index: 3, kind: input, shape index: {}]   ;;  %s1799_s4 = inlined_call_operand.vmem [shape: f32[32,32], index: 4, kind: input, shape index: {}]   ;;  %s1800_s5 = inlined_call_operand.vmem [shape: f32[32,1], index: 5, kind: input, shape index: {}]   ;;  %s1801_s6 = inlined_call_operand.vmem [shape: f32[1,32], index: 6, kind: input, shape index: {}]   ;;  %s1802_s7 = inlined_call_operand.<no memory space> [shape: f32[1,1], index: 7, kind: input, shape index: {}]   ;;  %s1803_s8 = inlined_call_operand.hbm [shape: f32[11,256], index: 8, kind: output, shape index: {0}]   ;;  %s1804_s9 = inlined_call_operand.hbm [shape: f32[10,10], index: 9, kind: output, shape index: {1}]  }
   0x1   :  { %v15_v0 = vstv %s1802_s7 }
   0x2   :  { %16 = vst [vmem:[#allocation2] sm:$0x1] %v15_v0 }
   0x3   :  { %17 = vsyncpa [#allocation4], 0  ;;  %v41_v1 = vld [vmem:[%s1796_s1 + $0x18] sm:$0xff]  ;;  %v40_v2 = vld [vmem:[%s1796_s1 + $0x10] sm:$0xff]  ;;  %v1361_v3 = vmov 0  }
   0x4   :  { %1284 = vset.pattern.permute.xlu1 %v1361_v3  ;;  %1283 = vset.pattern.permute.xlu0 %v1361_v3  ;;  %v45_v4 = vld [vmem:[%s1797_s2 + $0x18] sm:$0xff]  ;;  %v44_v5 = vld [vmem:[%s1797_s2 + $0x10] sm:$0xff] }
   0x5   :  { %63 = vperm.xlu0 %1283, %v41_v1   ;;  %58 = vperm.xlu1 %1284, %v40_v2  }
   0x9   :  { %102 = vperm.xlu0 %1283, %v45_v4   ;;  %97 = vperm.xlu1 %1284, %v44_v5  }
   0xa   :  { %18 = vsyncpa [#allocation6], 0  ;;  %v43_v6 = vld [vmem:[%s1797_s2 + $0x8] sm:$0xff]  ;;  %v135_v8 = vld [vmem:[%s1798_s3 + $0x18] sm:$0xff]  ;;  %v223_v14 = vmul.f32 %v45_v4, %v45_v4  ;;  %v222_v15 = vmul.f32 %v44_v5, %v44_v5  ;;  %v1362_v23 = vmov 0.0   ;;  %v67_v24 = vlaneseq }
   0xb   :  { %v39_v7 = vld [vmem:[%s1796_s1 + $0x8] sm:$0xff]  ;;  %v38_v9 = vld [vmem:[%s1796_s1] sm:$0xff]  ;;  %v134_v11 = vld [vmem:[%s1798_s3 + $0x10] sm:$0xff]  ;;  %v221_v16 = vmul.f32 %v43_v6, %v43_v6  ;;  %333 = vmatprep.mubr.f32.mxu0 %v1362_v23  ;;  %345 = vmatprep.mubr.f32.mxu1 %v1362_v23  ;;  %vm256_vm0 = vcmask 261120   ;;  %vm1057_vm1 = vcmask 1040384   ;;  %vm1060_vm2 = vcmask 1041408  }
   0xc   :  { %v42_v10 = vld [vmem:[%s1797_s2] sm:$0xff]  ;;  %v133_v12 = vld [vmem:[%s1798_s3 + $0x8] sm:$0xff]  ;;  %v628_v18 = vld [vmem:[%s1800_s5 + $0x18] sm:$0xff]  ;;  %v68_v25 = vshrl.u32 %v67_v24, 7  ;;  %vm1097_vm3 = vcmask 1042432   ;;  %vm1100_vm4 = vcmask 1045504  }
   0xd   :  { %92 = vperm.xlu1 %1284, %v43_v6   ;;  %53 = vperm.xlu0 %1283, %v39_v7   ;;  %v132_v13 = vld [vmem:[%s1798_s3] sm:$0xff]  ;;  %v220_v17 = vmul.f32 %v42_v10, %v42_v10  ;;  %v627_v19 = vld [vmem:[%s1800_s5 + $0x10] sm:$0xff]  ;;  %v626_v20 = vld [vmem:[%s1800_s5 + $0x8] sm:$0xff] }
   0xe   :  { %v625_v21 = vld [vmem:[%s1800_s5] sm:$0xff]  ;;  %v1479_v29 = vsub.s32 0, %v68_v25  ;;  %v73_v30 = vsub.s32 1, %v68_v25 }
   0xf   :  { %v1033_v22 = vld [vmem:[#allocation2] sm:$0x1]  ;;  %v1246_v28 = vld [vmem:[%s1795_s0 + $0x1] ss:$2 sm:$0x3] }
  0x10   :  { %v35_v31 = vld [vmem:[%s1795_s0] ss:$2 sm:$0x3]  ;;  %v109_v32 = vrot.slane %v1246_v28, %v1479_v29  ;;  %v113_v33 = vrot.slane %v1246_v28, %v73_v30 }
  0x11   :  { %153 = vperm.xlu0 %1283, %v135_v8   ;;  %48 = vperm.xlu1 %1284, %v38_v9   ;;  %v70_v36 = vrot.slane %v35_v31, %v1479_v29  ;;  %v74_v37 = vrot.slane %v35_v31, %v73_v30 }
  0x15   :  { %87 = vperm.xlu0 %1283, %v42_v10   ;;  %148 = vperm.xlu1 %1284, %v134_v11  }
  0x19   :  { %143 = vperm.xlu0 %1283, %v133_v12   ;;  %138 = vperm.xlu1 %1284, %v132_v13  }
  0x1d   :  { %241 = vperm.xlu0 %1283, %v223_v14   ;;  %236 = vperm.xlu1 %1284, %v222_v15  }
  0x21   :  { %231 = vperm.xlu0 %1283, %v221_v16   ;;  %226 = vperm.xlu1 %1284, %v220_v17  }
  0x25   :  { %646 = vperm.xlu0 %1283, %v628_v18   ;;  %641 = vperm.xlu1 %1284, %v627_v19  }
  0x29   :  { %636 = vperm.xlu0 %1283, %v626_v20   ;;  %631 = vperm.xlu1 %1284, %v625_v21  }
  0x2d   :  { %1036 = vperm.xlu0 %1283, %v1033_v22  }
  0x80   :  { %v1472_v26 = vpop.permute.xlu0 %63  ;;  %v1474_v27 = vpop.permute.xlu1 %58 }
  0x81   :  { %v83_v42 = vmul.f32 %v70_v36, %v1472_v26  ;;  %v84_v43 = vmul.f32 %v74_v37, %v1472_v26  ;;  %v81_v50 = vmul.f32 %v70_v36, %v1474_v27  ;;  %v82_v53 = vmul.f32 %v74_v37, %v1474_v27 }
  0x84   :  { %v1485_v34 = vpop.permute.xlu0 %102  ;;  %v1487_v35 = vpop.permute.xlu1 %97 }
  0x85   :  { %v122_v38 = vmul.f32 %v109_v32, %v1485_v34  ;;  %v123_v39 = vmul.f32 %v113_v33, %v1485_v34  ;;  %v120_v44 = vmul.f32 %v109_v32, %v1487_v35  ;;  %v121_v47 = vmul.f32 %v113_v33, %v1487_v35 }
  0x87   :  { %v130_v45 = vadd.f32 %v122_v38, %v83_v42  ;;  %v131_v46 = vadd.f32 %v123_v39, %v84_v43  ;;  %v128_v54 = vadd.f32 %v120_v44, %v81_v50  ;;  %v129_v57 = vadd.f32 %v121_v47, %v82_v53 }
  0x88   :  { %v1492_v40 = vpop.permute.xlu1 %92  ;;  %v1494_v41 = vpop.permute.xlu0 %53 }
  0x89   :  { %v79_v55 = vmul.f32 %v70_v36, %v1494_v41  ;;  %v118_v56 = vmul.f32 %v109_v32, %v1492_v40  ;;  %v80_v58 = vmul.f32 %v74_v37, %v1494_v41  ;;  %v119_v59 = vmul.f32 %v113_v33, %v1492_v40 }
  0x8b   :  { %v126_v4 = vadd.f32 %v118_v56, %v79_v55  ;;  %v127_v5 = vadd.f32 %v119_v59, %v80_v58 }
  0x8c   :  { %v154_v48 = vpop.permute.xlu0 %153  ;;  %v1500_v49 = vpop.permute.xlu1 %48 }
  0x8d   :  { %v162_v51 = vadd.f32 %v154_v48, %v130_v45  ;;  %v163_v52 = vadd.f32 %v154_v48, %v131_v46  ;;  %v77_v62 = vmul.f32 %v70_v36, %v1500_v49  ;;  %v78_v63 = vmul.f32 %v74_v37, %v1500_v49  ;;  %v1549_v36 = vld [vmem:[%s1799_s4] sm:$0xff]  ;;  %v1554_v37 = vld [vmem:[%s1799_s4 + $0x10] sm:$0xff] }
  0x8f   :  { %1285 = vtanh.f32 %v162_v51 }
  0x90   :  { %1287 = vtanh.f32 %v163_v52  ;;  %v1508_v60 = vpop.permute.xlu0 %87  ;;  %v149_v61 = vpop.permute.xlu1 %148 }
  0x91   :  { %v160_v0 = vadd.f32 %v149_v61, %v128_v54  ;;  %v161_v1 = vadd.f32 %v149_v61, %v129_v57  ;;  %v116_v2 = vmul.f32 %v109_v32, %v1508_v60  ;;  %v117_v3 = vmul.f32 %v113_v33, %v1508_v60 }
  0x93   :  { %1289 = vtanh.f32 %v160_v0  ;;  %v124_v6 = vadd.f32 %v116_v2, %v77_v62  ;;  %v125_v7 = vadd.f32 %v117_v3, %v78_v63 }
  0x94   :  { %1291 = vtanh.f32 %v161_v1  ;;  %v144_v8 = vpop.permute.xlu0 %143  ;;  %v139_v9 = vpop.permute.xlu1 %138 }
  0x95   :  { %v158_v10 = vadd.f32 %v144_v8, %v126_v4  ;;  %v159_v11 = vadd.f32 %v144_v8, %v127_v5  ;;  %v156_v12 = vadd.f32 %v139_v9, %v124_v6  ;;  %v157_v13 = vadd.f32 %v139_v9, %v125_v7 }
  0x97   :  { %1293 = vtanh.f32 %v158_v10 }
  0x98   :  { %1295 = vtanh.f32 %v159_v11  ;;  %v242_v0 = vpop.permute.xlu0 %241 }
  0x99   :  { %1297 = vtanh.f32 %v156_v12 }
  0x9a   :  { %1299 = vtanh.f32 %v157_v13 }
  0x9c   :  { %v1514_v14 = vpop.eup %1285 }
  0x9d   :  { %v1288_v15 = vpop.eup %1287  ;;  %v178_v19 = vmul.f32 %v1514_v14, %v1514_v14 }
  0x9e   :  { %293 = vmatprep.subr.mxu0 %v1288_v15  ;;  %1267 = vmatprep.subr.mxu1 %v1288_v15  ;;  %v179_v18 = vmul.f32 %v1288_v15, %v1288_v15  ;;  %v195_v56 = vmul.f32 -2.0, %v1288_v15 }
  0x9f   :  { %294 = vmatpush1.msra.mxu0 %v1514_v14  ;;  %1271 = vmatpush1.msra.mxu1 %v1514_v14  ;;  %v186_v30 = vsub.f32 1.0, %v178_v19 }
  0xa0   :  { %v1518_v16 = vpop.eup %1289  ;;  %v187_v24 = vsub.f32 1.0, %v179_v18 }
  0xa1   :  { %v1520_v17 = vpop.eup %1291  ;;  %v176_v25 = vmul.f32 %v1518_v16, %v1518_v16  ;;  %v210_v46 = vmul.f32 %v186_v30, %v1472_v26  ;;  %v218_v47 = vmul.f32 %v186_v30, %v1485_v34  ;;  %v192_v2 = vmul.f32 -2.0, %v1518_v16 }
  0xa2   :  { %295 = vmatprep.subr.mxu0 %v1520_v17  ;;  %1268 = vmatprep.subr.mxu1 %v1520_v17  ;;  %v177_v20 = vmul.f32 %v1520_v17, %v1520_v17  ;;  %v211_v43 = vmul.f32 %v187_v24, %v1472_v26  ;;  %v219_v44 = vmul.f32 %v187_v24, %v1485_v34  ;;  %v1581_v26 = vld [vmem:[%s1799_s4 + $0x8] sm:$0xff]  ;;  %v1586_v34 = vld [vmem:[%s1799_s4 + $0x18] sm:$0xff]  ;;  %v193_v61 = vmul.f32 -2.0, %v1520_v17  ;;  %v232_v17 = vpop.permute.xlu0 %231 }
  0xa3   :  { %296 = vmatpush1.msra.mxu0 %v1518_v16  ;;  %1272 = vmatpush1.msra.mxu1 %v1518_v16  ;;  %v184_v39 = vsub.f32 1.0, %v176_v25  ;;  %v203_v59 = vmul.f32 %v195_v56, %v187_v24 }
  0xa4   :  { %v1530_v21 = vpop.eup %1293  ;;  %v185_v32 = vsub.f32 1.0, %v177_v20 }
  0xa5   :  { %v1532_v22 = vpop.eup %1295  ;;  %v174_v38 = vmul.f32 %v1530_v21, %v1530_v21  ;;  %v208_v54 = vmul.f32 %v184_v39, %v1474_v27  ;;  %v216_v55 = vmul.f32 %v184_v39, %v1487_v35  ;;  %v200_v8 = vmul.f32 %v192_v2, %v184_v39 }
  0xa6   :  { %v1536_v28 = vpop.eup %1297  ;;  %297 = vmatprep.subr.mxu0 %v1532_v22  ;;  %1269 = vmatprep.subr.mxu1 %v1532_v22  ;;  %v175_v33 = vmul.f32 %v1532_v22, %v1532_v22  ;;  %v209_v50 = vmul.f32 %v185_v32, %v1474_v27  ;;  %v217_v51 = vmul.f32 %v185_v32, %v1487_v35  ;;  %v194_v27 = vmul.f32 -2.0, %v1514_v14 }
  0xa7   :  { %v1540_v31 = vpop.eup %1299  ;;  %298 = vmatpush1.msra.mxu0 %v1530_v21  ;;  %1273 = vmatpush1.msra.mxu1 %v1530_v21  ;;  %v172_v45 = vmul.f32 %v1536_v28, %v1536_v28  ;;  %v182_v52 = vsub.f32 1.0, %v174_v38  ;;  %v201_v5 = vmul.f32 %v193_v61, %v185_v32  ;;  %v191_v6 = vmul.f32 -2.0, %v1532_v22 }
  0xa8   :  { %299 = vmatprep.subr.mxu0 %v1540_v31  ;;  %1270 = vmatprep.subr.mxu1 %v1540_v31  ;;  %v173_v42 = vmul.f32 %v1540_v31, %v1540_v31  ;;  %v183_v48 = vsub.f32 1.0, %v175_v33  ;;  %v202_v1 = vmul.f32 %v194_v27, %v186_v30  ;;  %v251_v10 = vmul.f32 %v242_v0, %v203_v59 }
  0xa9   :  { %300 = vmatpush1.msra.mxu0 %v1536_v28  ;;  %1274 = vmatpush1.msra.mxu1 %v1536_v28  ;;  %v180_v57 = vsub.f32 1.0, %v172_v45  ;;  %v206_v62 = vmul.f32 %v182_v52, %v1494_v41  ;;  %v214_v63 = vmul.f32 %v182_v52, %v1492_v40  ;;  %v189_v12 = vmul.f32 -2.0, %v1540_v31  ;;  %v647_v31 = vpop.permute.xlu0 %646 }
  0xaa   :  { %1247 = vmatmul.mubr.msk.f32.vlgmr.msra.gmra.mxu0 %vm256_vm0, %v1549_v36  ;;  %1249 = vmatmul.mubr.msk.f32.vlgmr.msra.gmra.mxu1 %vm256_vm0, %v1554_v37  ;;  %v181_v53 = vsub.f32 1.0, %v173_v42  ;;  %v207_v35 = vmul.f32 %v183_v48, %v1494_v41  ;;  %v215_v58 = vmul.f32 %v183_v48, %v1492_v40  ;;  %v237_v41 = vpop.permute.xlu1 %236  ;;  %v190_v40 = vmul.f32 -2.0, %v1530_v21 }
  0xab   :  { %382 = vmatprep.subr.mxu1 %v211_v43  ;;  %471 = vmatprep.subr.mxu0 %v219_v44  ;;  %v204_v7 = vmul.f32 %v180_v57, %v1500_v49  ;;  %v212_v9 = vmul.f32 %v180_v57, %v1508_v60  ;;  %v199_v11 = vmul.f32 %v191_v6, %v183_v48  ;;  %v188_v15 = vmul.f32 -2.0, %v1536_v28 }
  0xac   :  { %383 = vmatpush1.msra.mxu1 %v210_v46  ;;  %472 = vmatpush1.msra.mxu0 %v218_v47  ;;  %v205_v3 = vmul.f32 %v181_v53, %v1500_v49  ;;  %v213_v4 = vmul.f32 %v181_v53, %v1508_v60  ;;  %v250_v13 = vmul.f32 %v242_v0, %v202_v1 }
  0xad   :  { %384 = vmatprep.subr.mxu1 %v209_v50  ;;  %473 = vmatprep.subr.mxu0 %v217_v51  ;;  %v198_v14 = vmul.f32 %v190_v40, %v182_v52  ;;  %v249_v49 = vmul.f32 %v237_v41, %v201_v5  ;;  %v197_v16 = vmul.f32 %v189_v12, %v181_v53  ;;  %v637_v45 = vpop.permute.xlu0 %636 }
  0xae   :  { %339 = vmatprep.mubr.f32.mxu0 %v1362_v23  ;;  %351 = vmatprep.mubr.f32.mxu1 %v1362_v23  ;;  %v248_v60 = vmul.f32 %v237_v41, %v200_v8  ;;  %v196_v18 = vmul.f32 %v188_v15, %v180_v57  ;;  %v247_v19 = vmul.f32 %v232_v17, %v199_v11  ;;  %v227_v21 = vpop.permute.xlu1 %226 }
  0xaf   :  { %385 = vmatpush1.msra.mxu1 %v208_v54  ;;  %474 = vmatpush1.msra.mxu0 %v216_v55  ;;  %v246_v20 = vmul.f32 %v232_v17, %v198_v14  ;;  %v245_v22 = vmul.f32 %v227_v21, %v197_v16 }
  0xb0   :  { %1248 = vmatmul.mubr.msk.f32.gmra.mxu0 %vm256_vm0, %v1581_v26  ;;  %1250 = vmatmul.mubr.msk.f32.gmra.mxu1 %vm256_vm0, %v1586_v34  ;;  %v244_v24 = vmul.f32 %v227_v21, %v196_v18 }
  0xb1   :  { %386 = vmatprep.subr.mxu1 %v207_v35  ;;  %475 = vmatprep.subr.mxu0 %v215_v58 }
  0xb2   :  { %387 = vmatpush1.msra.mxu1 %v206_v62  ;;  %476 = vmatpush1.msra.mxu0 %v214_v63  ;;  %v642_v25 = vpop.permute.xlu1 %641 }
  0xb3   :  { %388 = vmatprep.subr.mxu1 %v205_v3  ;;  %477 = vmatprep.subr.mxu0 %v213_v4 }
  0xb4   :  { %389 = vmatpush1.msra.mxu1 %v204_v7  ;;  %422 = vmatprep.mubr.f32.mxu1 %v1362_v23 }
  0xb5   :  { %478 = vmatpush1.msra.mxu0 %v212_v9  ;;  %1251 = vmatmul.mubr.msk.f32.vlgmr.msra.gmra.mxu1 %vm256_vm0, %v1549_v36 }
  0xb6   :  { %560 = vmatprep.subr.mxu1 %v251_v10  ;;  %428 = vmatprep.mubr.f32.mxu1 %v1362_v23  ;;  %v632_v32 = vpop.permute.xlu1 %631 }
  0xb7   :  { %561 = vmatpush1.msra.mxu1 %v250_v13  ;;  %511 = vmatprep.mubr.f32.mxu0 %v1362_v23 }
  0xb8   :  { %562 = vmatprep.subr.mxu1 %v249_v49  ;;  %1255 = vmatmul.mubr.msk.f32.vlgmr.msra.gmra.mxu0 %vm256_vm0, %v1549_v36 }
  0xb9   :  { %563 = vmatpush1.msra.mxu1 %v248_v60  ;;  %517 = vmatprep.mubr.f32.mxu0 %v1362_v23 }
  0xba   :  { %1252 = vmatmul.mubr.msk.f32.gmra.mxu1 %vm256_vm0, %v1581_v26  ;;  %564 = vmatprep.subr.mxu1 %v247_v19 }
  0xbb   :  { %565 = vmatpush1.msra.mxu1 %v246_v20  ;;  %434 = vmatprep.mubr.f32.mxu1 %v1362_v23 }
  0xbc   :  { %566 = vmatprep.subr.mxu1 %v245_v22  ;;  %1256 = vmatmul.mubr.msk.f32.gmra.mxu0 %vm256_vm0, %v1581_v26 }
  0xbd   :  { %567 = vmatpush1.msra.mxu1 %v244_v24  ;;  %523 = vmatprep.mubr.f32.mxu0 %v1362_v23 }
  0xbe   :  { %1253 = vmatmul.mubr.msk.f32.gmra.mxu1 %vm256_vm0, %v1554_v37 }
  0xbf   :  { %440 = vmatprep.mubr.f32.mxu1 %v1362_v23 }
  0xc0   :  { %1257 = vmatmul.mubr.msk.f32.gmra.mxu0 %vm256_vm0, %v1554_v37 }
  0xc1   :  { %529 = vmatprep.mubr.f32.mxu0 %v1362_v23 }
  0xc2   :  { %1254 = vmatmul.mubr.msk.f32.gmra.mxu1 %vm256_vm0, %v1586_v34 }
  0xc3   :  { %600 = vmatprep.mubr.f32.mxu1 %v1362_v23 }
  0xc4   :  { %1258 = vmatmul.mubr.msk.f32.gmra.mxu0 %vm256_vm0, %v1586_v34 }
  0xc5   :  { %813 = vmatprep.mubr.f32.mxu0 %v1362_v23 }
  0xc6   :  { %1259 = vmatmul.mubr.msk.f32.vlgmr.msra.gmra.mxu1 %vm256_vm0, %v1549_v36 }
  0xc7   :  { %606 = vmatprep.mubr.f32.mxu1 %v1362_v23 }
  0xca   :  { %1260 = vmatmul.mubr.msk.f32.gmra.mxu1 %vm256_vm0, %v1581_v26 }
  0xcb   :  { %612 = vmatprep.mubr.f32.mxu1 %v1362_v23 }
  0xce   :  { %1261 = vmatmul.mubr.msk.f32.gmra.mxu1 %vm256_vm0, %v1554_v37 }
  0xcf   :  { %618 = vmatprep.mubr.f32.mxu1 %v1362_v23 }
  0xd2   :  { %1262 = vmatmul.mubr.msk.f32.gmra.mxu1 %vm256_vm0, %v1586_v34 }
  0xd3   :  { %884 = vmatprep.mubr.f32.mxu1 %v1362_v23 }
 0x16a   :  { %v335_v28 = vpop.f32.mrf.mxu0  ;;  %v347_v30 = vpop.f32.mrf.mxu1 }
 0x16b   :  { %v649_v33 = vadd.f32 %v632_v32, %v335_v28  ;;  %v653_v39 = vadd.f32 %v642_v25, %v347_v30 }
 0x16c   :  { %v337_v36 = vpop.f32.mrf.mxu0  ;;  %v349_v38 = vpop.f32.mrf.mxu1 }
 0x16d   :  { %v650_v42 = vadd.f32 %v632_v32, %v337_v36  ;;  %v654_v43 = vadd.f32 %v642_v25, %v349_v38  ;;  %1301 = vtanh.f32 %v649_v33  ;;  %v1699_v36 = vld [vmem:[%s1801_s6] sm:$0x1]  ;;  %s1363_s6 = smov [#allocation3]  }
 0x16e   :  { %1303 = vtanh.f32 %v653_v39  ;;  %s1219_s28 = sshll.u32 %s1363_s6, 4  ;;  %s1220_s28 = int_to_ptr.vmem [resolvable:$true] %s1219_s28 }
 0x16f   :  { %1305 = vtanh.f32 %v650_v42  ;;  %s1317_s29 = scalar_lea.vmem %s1220_s28, 512  ;;  %p1322_p1 = scmp.lt.s32.totalorder %s1220_s28, %s1220_s28 }
 0x170   :  { %v341_v37 = vpop.f32.mrf.mxu0  ;;  %v353_v44 = vpop.f32.mrf.mxu1  ;;  %1307 = vtanh.f32 %v654_v43  ;;  %p1318_p0 = scmp.ne.s32.totalorder %s1220_s28, %s1317_s29  ;;  %p1323_p2 = scmp.lt.s32.totalorder %s1317_s29, %s1317_s29 }
 0x171   :  { %v655_v46 = vadd.f32 %v647_v31, %v353_v44  ;;  %v651_v50 = vadd.f32 %v637_v45, %v341_v37 }
 0x172   :  { %v343_v47 = vpop.f32.mrf.mxu0  ;;  %v355_v48 = vpop.f32.mrf.mxu1  ;;  %p1324_p3 = por %p1323_p2, %p1322_p1 }
 0x173   :  { %v652_v51 = vadd.f32 %v637_v45, %v343_v47  ;;  %v656_v52 = vadd.f32 %v647_v31, %v355_v48  ;;  %1309 = vtanh.f32 %v655_v46 }
 0x174   :  { %p1325_p4 = pnand %p1324_p3, %p1318_p0 }
 0x175   :  { %1311 = vtanh.f32 %v652_v51  ;;  %v424_v53 = vpop.f32.mrf.mxu1 }
 0x176   :  { %1313 = vtanh.f32 %v656_v52 }
 0x177   :  { %1315 = vtanh.f32 %v651_v50  ;;  %v1647_v54 = vpop.f32.mrf.mxu1 }
 0x178   :  { %v1649_v55 = vpop.f32.mrf.mxu0 }
 0x17a   :  { %v1651_v26 = vpop.f32.mrf.mxu1  ;;  %v1653_v34 = vpop.f32.mrf.mxu0 }
 0x17b   :  { %v1659_v27 = vpop.eup %1301 }
 0x17c   :  { %v1655_v56 = vpop.f32.mrf.mxu1  ;;  %v1657_v57 = vpop.f32.mrf.mxu0  ;;  %v665_v3 = vmul.f32 %v1659_v27, %v1659_v27 }
 0x17d   :  { %v1304_v35 = vpop.eup %1303 }
 0x17e   :  { %v436_v58 = vpop.f32.mrf.mxu1  ;;  %v1661_v59 = vpop.f32.mrf.mxu0  ;;  %v669_v4 = vmul.f32 %v1304_v35, %v1304_v35  ;;  %v1671_v12 = vsub.f32 1.0, %v665_v3  ;;  %v685_v22 = vmul.f32 -2.0, %v1304_v35 }
 0x17f   :  { %v1306_v61 = vpop.eup %1305 }
 0x180   :  { %v1308_v62 = vpop.eup %1307  ;;  %v438_v63 = vpop.f32.mrf.mxu1  ;;  %v666_v40 = vmul.f32 %v1306_v61, %v1306_v61  ;;  %v1673_v14 = vsub.f32 1.0, %v669_v4  ;;  %v682_v21 = vmul.f32 -2.0, %v1306_v61  ;;  %v697_v28 = vmul.f32 %v1671_v12, %v424_v53 }
 0x181   :  { %v1663_v0 = vpop.f32.mrf.mxu0  ;;  %v1310_v1 = vpop.eup %1309  ;;  %v670_v9 = vmul.f32 %v1308_v62, %v1308_v62  ;;  %v686_v24 = vmul.f32 -2.0, %v1308_v62 }
 0x182   :  { %v1312_v2 = vpop.eup %1311  ;;  %v442_v5 = vpop.f32.mrf.mxu1  ;;  %v671_v41 = vmul.f32 %v1310_v1, %v1310_v1  ;;  %v1679_v17 = vsub.f32 1.0, %v666_v40  ;;  %v701_v31 = vmul.f32 %v1673_v14, %v436_v58  ;;  %v693_v42 = vmul.f32 %v685_v22, %v1673_v14 }
 0x183   :  { %v1667_v6 = vpop.f32.mrf.mxu0  ;;  %v1314_v7 = vpop.eup %1313  ;;  %v668_v13 = vmul.f32 %v1312_v2, %v1312_v2  ;;  %v1681_v18 = vsub.f32 1.0, %v670_v9  ;;  %v687_v45 = vmul.f32 -2.0, %v1310_v1  ;;  %v684_v48 = vmul.f32 -2.0, %v1312_v2 }
 0x184   :  { %v1316_v8 = vpop.eup %1315  ;;  %v444_v10 = vpop.f32.mrf.mxu1  ;;  %773 = vmatprep.subr.mxu0 %v1314_v7  ;;  %v672_v15 = vmul.f32 %v1314_v7, %v1314_v7  ;;  %v1677_v60 = vsub.f32 1.0, %v671_v41  ;;  %v688_v43 = vmul.f32 -2.0, %v1314_v7  ;;  %v690_v37 = vmul.f32 %v682_v21, %v1679_v17 }
 0x185   :  { %v1669_v11 = vpop.f32.mrf.mxu0  ;;  %774 = vmatpush1.msra.mxu0 %v1310_v1  ;;  %v667_v16 = vmul.f32 %v1316_v8, %v1316_v8  ;;  %v1690_v30 = vsub.f32 1.0, %v668_v13  ;;  %v702_v44 = vmul.f32 %v1681_v18, %v438_v63  ;;  %v709_v50 = vmul.f32 %v1673_v14, %v1663_v0 }
 0x186   :  { %v1675_v49 = vpop.f32.mrf.mxu1  ;;  %775 = vmatprep.subr.mxu0 %v1308_v62  ;;  %v1683_v19 = vsub.f32 1.0, %v672_v15  ;;  %v703_v39 = vmul.f32 %v1677_v60, %v442_v5  ;;  %v711_v51 = vmul.f32 %v1677_v60, %v1669_v11  ;;  %v710_v58 = vmul.f32 %v1681_v18, %v1667_v6 }
 0x187   :  { %776 = vmatpush1.msra.mxu0 %v1304_v35  ;;  %v1687_v25 = vpop.f32.mrf.mxu0  ;;  %v1701_v38 = vsub.f32 1.0, %v667_v16  ;;  %v700_v53 = vmul.f32 %v1690_v30, %v1655_v56  ;;  %v683_v35 = vmul.f32 -2.0, %v1316_v8  ;;  %v681_v1 = vmul.f32 -2.0, %v1659_v27 }
 0x188   :  { %v1685_v20 = vpop.f32.mrf.mxu1  ;;  %777 = vmatprep.subr.mxu0 %v1312_v2  ;;  %v704_v32 = vmul.f32 %v1683_v19, %v444_v10  ;;  %v712_v46 = vmul.f32 %v1683_v19, %v1687_v25  ;;  %v696_v52 = vmul.f32 %v688_v43, %v1683_v19  ;;  %v692_v2 = vmul.f32 %v684_v48, %v1690_v30 }
 0x189   :  { %778 = vmatpush1.msra.mxu0 %v1316_v8  ;;  %v699_v63 = vmul.f32 %v1701_v38, %v1651_v26  ;;  %v694_v3 = vmul.f32 %v686_v24, %v1681_v18  ;;  %v698_v56 = vmul.f32 %v1679_v17, %v1647_v54  ;;  %v691_v4 = vmul.f32 %v683_v35, %v1701_v38 }
 0x18a   :  { %v1694_v33 = vpop.f32.mrf.mxu1  ;;  %779 = vmatprep.subr.mxu0 %v1306_v61  ;;  %844 = vmatprep.subr.mxu1 %v704_v32  ;;  %v695_v61 = vmul.f32 %v687_v45, %v1677_v60  ;;  %v708_v5 = vmul.f32 %v1690_v30, %v1661_v59  ;;  %v689_v26 = vmul.f32 %v681_v1, %v1671_v12 }
 0x18b   :  { %780 = vmatpush1.msra.mxu0 %v1659_v27  ;;  %845 = vmatpush1.msra.mxu1 %v703_v39  ;;  %v707_v27 = vmul.f32 %v1701_v38, %v1657_v57  ;;  %v720_v41 = vmul.f32 %v696_v52, %v1687_v25  ;;  %v705_v54 = vmul.f32 %v1671_v12, %v1649_v55 }
 0x18c   :  { %v610_v47 = vpop.f32.mrf.mxu1  ;;  %1263 = vmatmul.mubr.msk.f32.vlgmr.msra.gmra.mxu0 %vm256_vm0, %v1699_v36  ;;  %846 = vmatprep.subr.mxu1 %v702_v44  ;;  %v706_v8 = vmul.f32 %v1679_v17, %v1653_v34  ;;  %v719_v40 = vmul.f32 %v695_v61, %v1669_v11  ;;  %v714_v10 = vmul.f32 %v690_v37, %v1653_v34 }
 0x18d   :  { %915 = vmatprep.subr.mxu0 %v712_v46  ;;  %847 = vmatpush1.msra.mxu1 %v701_v31  ;;  %v716_v13 = vmul.f32 %v692_v2, %v1661_v59  ;;  %v718_v15 = vmul.f32 %v694_v3, %v1667_v6  ;;  %v715_v16 = vmul.f32 %v691_v4, %v1657_v57 }
 0x18e   :  { %v614_v62 = vpop.f32.mrf.mxu1  ;;  %916 = vmatpush1.msra.mxu0 %v711_v51  ;;  %848 = vmatprep.subr.mxu1 %v700_v53  ;;  %v717_v21 = vmul.f32 %v693_v42, %v1663_v0  ;;  %v728_v31 = vmul.f32 %v720_v41, %v1687_v25  ;;  %v727_v42 = vmul.f32 %v719_v40, %v1669_v11 }
 0x18f   :  { %917 = vmatprep.subr.mxu0 %v710_v58  ;;  %849 = vmatpush1.msra.mxu1 %v699_v63  ;;  %v724_v25 = vmul.f32 %v716_v13, %v1661_v59  ;;  %v723_v37 = vmul.f32 %v715_v16, %v1657_v57  ;;  %v731_v11 = vmul.f32 %v1701_v38, %v1694_v33 }
 0x190   :  { %v616_v7 = vpop.f32.mrf.mxu1  ;;  %918 = vmatpush1.msra.mxu0 %v709_v50  ;;  %850 = vmatprep.subr.mxu1 %v698_v56  ;;  %v725_v44 = vmul.f32 %v717_v21, %v1663_v0  ;;  %v722_v45 = vmul.f32 %v714_v10, %v1653_v34 }
 0x191   :  { %919 = vmatprep.subr.mxu0 %v708_v5  ;;  %851 = vmatpush1.msra.mxu1 %v697_v28  ;;  %v734_v32 = vmul.f32 %v1681_v18, %v616_v7  ;;  %v713_v28 = vmul.f32 %v689_v26, %v1649_v55  ;;  %v726_v18 = vmul.f32 %v718_v15, %v1667_v6 }
 0x192   :  { %v620_v9 = vpop.f32.mrf.mxu1  ;;  %920 = vmatpush1.msra.mxu0 %v707_v27  ;;  %1264 = vmatmul.mubr.msk.f32.vlgmr.msra.gmra.mxu1 %vm256_vm0, %v1699_v36  ;;  %v729_v6 = vmul.f32 %v1671_v12, %v1675_v49  ;;  %v739_v0 = vadd.f32 %v731_v11, %v723_v37 }
 0x193   :  { %v735_v22 = vmul.f32 %v1677_v60, %v620_v9  ;;  %921 = vmatprep.subr.mxu0 %v706_v8  ;;  %955 = vmatprep.mubr.f32.mxu0 %v1362_v23  ;;  %v733_v60 = vmul.f32 %v1673_v14, %v614_v62  ;;  %v742_v46 = vadd.f32 %v734_v32, %v726_v18 }
 0x194   :  { %v622_v24 = vpop.f32.mrf.mxu1  ;;  %922 = vmatpush1.msra.mxu0 %v705_v54  ;;  %1026 = vmatprep.mubr.f32.mxu1 %v1362_v23  ;;  %v730_v23 = vmul.f32 %v1679_v17, %v1685_v20  ;;  %v721_v59 = vmul.f32 %v713_v28, %v1649_v55  ;;  %v1037_v55 = vpop.permute.xlu0 %1036 }
 0x195   :  { %v736_v39 = vmul.f32 %v1683_v19, %v622_v24  ;;  %1265 = vmatmul.mubr.msk.f32.vlgmr.msra.gmra.mxu0 %vm256_vm0, %v1699_v36  ;;  %v732_v19 = vmul.f32 %v1690_v30, %v610_v47  ;;  %v743_v14 = vadd.f32 %v735_v22, %v727_v42  ;;  %v741_v30 = vadd.f32 %v733_v60, %v725_v44 }
 0x196   :  { %v738_v33 = vadd.f32 %v730_v23, %v722_v45  ;;  %v737_v38 = vadd.f32 %v729_v6, %v721_v59  ;;  %v1042_v12 = vrot.slane %v1037_v55, %v1479_v29 }
 0x197   :  { %v744_v43 = vadd.f32 %v736_v39, %v728_v31  ;;  %v740_v57 = vadd.f32 %v732_v19, %v724_v25 }
 0x199   :  { %986 = vmatprep.subr.mxu1 %v744_v43 }
 0x19a   :  { %987 = vmatpush1.msra.mxu1 %v743_v14 }
 0x19b   :  { %988 = vmatprep.subr.mxu1 %v742_v46 }
 0x19c   :  { %989 = vmatpush1.msra.mxu1 %v741_v30 }
 0x19d   :  { %990 = vmatprep.subr.mxu1 %v740_v57 }
 0x19e   :  { %991 = vmatpush1.msra.mxu1 %v739_v0 }
 0x19f   :  { %992 = vmatprep.subr.mxu1 %v738_v33 }
 0x1a0   :  { %993 = vmatpush1.msra.mxu1 %v737_v38 }
 0x1a1   :  { %1266 = vmatmul.mubr.msk.f32.vlgmr.msra.gmra.mxu1 %vm256_vm0, %v1699_v36 }
 0x24c   :  { %v815_v34 = vpop.f32.mrf.mxu0 }
 0x24d   :  { %v1043_v20 = vadd.f32 %v1042_v12, %v815_v34 }
 0x24e   :  { %v817_v17 = vpop.f32.mrf.mxu0 }
 0x24f   :  { %v1044_v48 = vadd.f32 %v1042_v12, %v817_v17  ;;  %v1073_v52 = vmul.f32 %v1043_v20, %v1043_v20  ;;  %v1066_v63 = vrot.slane %v1043_v20, %v1479_v29 }
 0x251   :  { %v1074_v35 = vmul.f32 %v1044_v48, %v1044_v48  ;;  %v1078_v1 = vrot.slane %v1073_v52, %v1479_v29  ;;  %v1070_v3 = vrot.slane %v1044_v48, %v1479_v29 }
 0x252   :  { %v886_v47 = vpop.f32.mrf.mxu1 }
 0x253   :  { %v1082_v5 = vrot.slane %v1074_v35, %v1479_v29 }
 0x254   :  { %v888_v53 = vpop.f32.mrf.mxu1 }
 0x255   :  { %v957_v49 = vpop.f32.mrf.mxu0 }
 0x256   :  { %v1047_v50 = vrot.slane %v957_v49, 7 }
 0x257   :  { %v959_v51 = vpop.f32.mrf.mxu0 }
 0x258   :  { %v1058_v58 = vsel %vm1057_vm1, 1.0, %v1047_v50  ;;  %v1048_v36 = vrot.slane %v959_v51, 7 }
 0x25a   :  { %v1059_v27 = vsel %vm1057_vm1, 1.0, %v1048_v36 }
 0x261   :  { %v1028_v61 = vpop.f32.mrf.mxu1 }
 0x262   :  { %v1053_v62 = vrot.slane %v1028_v61, 6 }
 0x263   :  { %v1030_v2 = vpop.f32.mrf.mxu1 }
 0x264   :  { %v1061_v56 = vsel %vm1060_vm2, %v1058_v58, %v1053_v62  ;;  %v1054_v4 = vrot.slane %v1030_v2, 6 }
 0x265   :  { %v1071_v7 = vmul.f32 %v1066_v63, %v1061_v56  ;;  %v1083_v26 = vmul.f32 %v1078_v1, %v1061_v56 }
 0x266   :  { %v1062_v41 = vsel %vm1060_vm2, %v1059_v27, %v1054_v4 }
 0x267   :  { %v1087_v54 = vrot.slane %v1071_v7, 5  ;;  %v1093_v8 = vrot.slane %v1083_v26, 2  ;;  %v1072_v40 = vmul.f32 %v1070_v3, %v1062_v41  ;;  %v1084_v9 = vmul.f32 %v1082_v5, %v1062_v41 }
 0x269   :  { %v1098_v10 = vsel %vm1097_vm3, %v1061_v56, %v1087_v54  ;;  %v1088_v13 = vrot.slane %v1072_v40, 5  ;;  %v1094_v15 = vrot.slane %v1084_v9, 2  ;;  %v1107_v24 = vrot.slane %v1093_v8, 7 }
 0x26a   :  { %v1101_v16 = vsel %vm1100_vm4, %v1098_v10, %v1093_v8 }
 0x26b   :  { %v1099_v21 = vsel %vm1097_vm3, %v1062_v41, %v1088_v13  ;;  %v1105_v22 = vrot.slane %v1101_v16, 7  ;;  %v1109_v32 = vrot.slane %v1094_v15, 7 }
 0x26c   :  { %v1102_v31 = vsel %vm1100_vm4, %v1099_v21, %v1094_v15 }
 0x26d   :  { %v1106_v29 = vrot.slane %v1102_v31, 7  ;;  %v1108_v39 = vsel %vm1057_vm1, %v1105_v22, %v1107_v24  ;;  %v1115_v28 = vsel %vm1057_vm1, %v886_v47, %v1105_v22 }
 0x26e   :  { %v1121_v42 = vrot.slane %v1108_v39, 7  ;;  %v1119_v60 = vrot.slane %v1115_v28, 7 }
 0x26f   :  { %v1110_v25 = vsel %vm1057_vm1, %v1106_v29, %v1109_v32  ;;  %v1116_v18 = vsel %vm1057_vm1, %v888_v53, %v1106_v29 }
 0x270   :  { %v1123_v19 = vrot.slane %v1110_v25, 7  ;;  %1163 = vmatprep.subr.mxu0 %v1110_v25  ;;  %v1120_v43 = vrot.slane %v1116_v18, 7  ;;  %1199 = vmatprep.mubr.f32.mxu0 %v1116_v18  ;;  %v1122_v37 = vsel %vm1057_vm1, %v1119_v60, %v1121_v42  ;;  %v1129_v44 = vsel %vm1057_vm1, %v1043_v20, %v1119_v60 }
 0x271   :  { %1164 = vmatpush1.xpose.msra.mxu0 %v1108_v39  ;;  %1131 = vst [vmem:[#allocation3] sm:$0xff] %v1129_v44  ;;  %1133 = vst [vmem:[#allocation3 + $0x10] sm:$0x7] %v1122_v37 }
 0x272   :  { %v1124_v11 = vsel %vm1057_vm1, %v1120_v43, %v1123_v19  ;;  %v1130_v14 = vsel %vm1057_vm1, %v1044_v48, %v1120_v43  ;;  %1165 = vmatprep.subr.mxu0 %v1116_v18 }
 0x273   :  { %1132 = vst [vmem:[#allocation3 + $0x8] sm:$0xff] %v1130_v14  ;;  %1134 = vst [vmem:[#allocation3 + $0x18] sm:$0x7] %v1124_v11 }
 0x275   :  { %1166 = vmatpush1.xpose.msra.mxu0 %v1115_v28 }
 0x278   :  { %1200 = vmatmul.mubr.f32.vlgmr.msra.gmra.mxu0 %v1115_v28 }
 0x279   :  { %1204 = vmatprep.mubr.f32.mxu0 %v1110_v25 }
 0x27c   :  { %1205 = vmatmul.mubr.f32.gmra.mxu0 %v1108_v39 }
 0x27d   :  { %1328 = shalt.err (!%p1325_p4)
}
 0x27e   :  { %s1364_s30 = smov 256   ;;  %s1365_s10 = smov 16   ;;  %vm1210_vm5 = vcmask 80896   ;;  %vm1212_vm6 = vcmask 74752  }
 0x27f   :  { %1225 = dma.vmem_to_hbm [thread:$0]  %s1220_s28, 512, %s1803_s8, [#allocation4], %s1364_s30, %s1364_s30, %s1365_s10  }
 0x280   :  { %s1366_s1 = smov [#allocation5]  }
 0x281   :  { %s1231_s2 = sshll.u32 %s1366_s1, 4  ;;  %s1232_s2 = int_to_ptr.vmem [resolvable:$true] %s1231_s2 }
 0x282   :  { %s1337_s13 = scalar_lea.vmem %s1232_s2, 256  ;;  %p1342_p6 = scmp.lt.s32.totalorder %s1232_s2, %s1232_s2 }
 0x283   :  { %p1338_p5 = scmp.ne.s32.totalorder %s1232_s2, %s1337_s13  ;;  %p1343_p7 = scmp.lt.s32.totalorder %s1337_s13, %s1337_s13 }
 0x285   :  { %p1344_p8 = por %p1343_p7, %p1342_p6 }
 0x287   :  { %p1345_p9 = pnand %p1344_p8, %p1338_p5 }
 0x338   :  { %v1201_v45 = vpop.f32.mrf.mxu0 }
 0x339   :  { %1211 = vst.msk [vmem:[#allocation5] sm:$0xff] %vm1210_vm5, %v1201_v45 }
 0x33a   :  { %v1203_v23 = vpop.f32.mrf.mxu0 }
 0x33c   :  { %v1206_v46 = vpop.f32.mrf.mxu0 }
 0x33d   :  { %1213 = vst.msk [vmem:[#allocation5 + $0x8] sm:$0x3] %vm1212_vm6, %v1206_v46 }
 0x33e   :  { %v1208_v59 = vpop.f32.mrf.mxu0 }
 0x33f   :  { %1348 = shalt.err (!%p1345_p9)
}
 0x340   :  { %s1367_s14 = smov 128   ;;  %s1368_s8 = smov 8  }
 0x341   :  { %1237 = dma.vmem_to_hbm [thread:$0]  %s1232_s2, 256, %s1804_s9, [#allocation6], %s1367_s14, %s1367_s14, %s1368_s8  }
 0x342   :  { %1357 = dma.done.wait [#allocation4], 512  }
 0x343   :  { %1358 = vsyncadd [#allocation4], 4294966784 }
 0x344   :  { %1359 = dma.done.wait [#allocation6], 256  }
 0x345   :  { %1360 = vsyncadd [#allocation6], 4294967040 }
 0x346   :  { %1244 = vsyncpa [#allocation4], 1 }
 0x347   :  { %1245 = vsyncpa [#allocation6], 1 }

</bundles_post_ra>
